<compile_context>
chip_gen: v5e
topology: v5e:2x2
jax: 0.10.0
libtpu: 0.0.40
codegen_flags: <defaults>
</compile_context>

<pallas_src>
import functools

import jax
import jax.numpy as jnp
from jax import lax
from jax.experimental import pallas as pl
from jax.experimental.pallas import tpu as pltpu

_LANE = 128


def _cdiv(a, b):
    return -(-a // b)


def _sublane_multiple(*arrays):
    """Second-minor block dim must be a multiple of the packed sublane count."""
    m = 8
    for a in arrays:
        itemsize = jnp.dtype(a.dtype).itemsize
        if itemsize in (1, 2, 4):
            m = max(m, 32 // itemsize)       # f32 -> 8, bf16 -> 16, int8 -> 32
    return m


def _num_tensorcores():
    """Best-effort TensorCore count per chip (2 on v4/v5p/v7x, else 1)."""
    try:
        info = pltpu.get_tpu_info()
        for attr in ("num_cores", "core_count", "num_tensorcores"):
            n = getattr(info, attr, None)
            if isinstance(n, int) and n > 0:
                return n
    except Exception:
        pass
    try:
        kind = jax.devices()[0].device_kind.lower()
        if ("v7" in kind) or ("v4" in kind) or ("v5p" in kind):
            return 2
    except Exception:
        pass
    return 1


def _detection_loss_kernel(cls_t_ref, cls_p_ref, mask_ref, geo_t_ref, geo_p_ref,
                           out_ref, acc_ref, *, tile_rows, rt_per_core,
                           hw_valid, needs_mask):
    b = pl.program_id(1)
    j = pl.program_id(2)
    is_first = jnp.logical_and(b == 0, j == 0)
    is_last = jnp.logical_and(b == pl.num_programs(1) - 1,
                              j == pl.num_programs(2) - 1)

    @pl.when(is_first)
    def _():
        acc_ref[...] = jnp.zeros_like(acc_ref)

    f32 = jnp.float32
    ct = cls_t_ref[...].astype(f32)          # (T, 128)
    cp = cls_p_ref[...].astype(f32)
    m = mask_ref[...].astype(f32)

    d1_gt = geo_t_ref[0].astype(f32)         # (T, 128) each
    d2_gt = geo_t_ref[1].astype(f32)
    d3_gt = geo_t_ref[2].astype(f32)
    d4_gt = geo_t_ref[3].astype(f32)
    th_gt = geo_t_ref[4].astype(f32)
    d1_pr = geo_p_ref[0].astype(f32)
    d2_pr = geo_p_ref[1].astype(f32)
    d3_pr = geo_p_ref[2].astype(f32)
    d4_pr = geo_p_ref[3].astype(f32)
    th_pr = geo_p_ref[4].astype(f32)

    # ---- geo IoU loss (elementwise) ----
    area_gt = (d1_gt + d3_gt) * (d2_gt + d4_gt)
    area_pr = (d1_pr + d3_pr) * (d2_pr + d4_pr)
    w_union = jnp.minimum(d2_gt, d2_pr) + jnp.minimum(d4_gt, d4_pr)
    h_union = jnp.minimum(d1_gt, d1_pr) + jnp.minimum(d3_gt, d3_pr)
    area_int = w_union * h_union
    area_uni = area_gt + area_pr - area_int
    # -log((ai+1)/(au+1)) == log(au+1) - log(ai+1): no divide, two EUP logs.
    l_aabb = jnp.log(area_uni + 1.0) - jnp.log(area_int + 1.0)
    l_theta = 1.0 - jnp.cos(th_pr - th_gt)
    l_g = l_aabb + 20.0 * l_theta

    w = ct * m                               # y_true_cls * training_mask
    t_int = w * cp                           # dice intersection term
    t_w = w                                  # sum(y_true * mask)
    t_cpm = cp * m                           # sum(y_pred * mask)
    t_lgw = l_g * w                          # masked geo loss
    t_nz = (w != 0.0).astype(f32)            # nonzero count

    if needs_mask:
        # Tail of the last row tile (and any clamped overflow tile on the
        # core-split axis) contains undefined VMEM; zero every accumulated
        # term there via a global element-index mask (jnp.where also kills
        # NaNs produced from garbage geo values).
        c = pl.program_id(0)
        row0 = (c * rt_per_core + j) * tile_rows
        rows = lax.broadcasted_iota(jnp.int32, ct.shape, 0)
        lanes = lax.broadcasted_iota(jnp.int32, ct.shape, 1)
        valid = (row0 + rows) * _LANE + lanes < hw_valid
        zero = jnp.zeros_like(ct)
        t_int = jnp.where(valid, t_int, zero)
        t_w = jnp.where(valid, t_w, zero)
        t_cpm = jnp.where(valid, t_cpm, zero)
        t_lgw = jnp.where(valid, t_lgw, zero)
        t_nz = jnp.where(valid, t_nz, zero)

    # ---- single coalesced (8, 128) accumulator RMW per grid step ----
    partial = jnp.concatenate(
        [jnp.sum(t_int, axis=0, keepdims=True),
         jnp.sum(t_w, axis=0, keepdims=True),
         jnp.sum(t_cpm, axis=0, keepdims=True),
         jnp.sum(t_lgw, axis=0, keepdims=True),
         jnp.sum(t_nz, axis=0, keepdims=True),
         jnp.zeros((3, _LANE), f32)], axis=0)
    acc_ref[...] += partial

    @pl.when(is_last)
    def _():
        out_ref[0] = acc_ref[...]


def _run_detection_kernel(cls_t, cls_p, msk, geo_t, geo_p, *,
                          tile_rows, rt_blocks, rt_per_core, num_cores,
                          hw_valid, needs_mask):
    """Inputs already in kernel layout: cls maps (B, R, 128), geo (B, 5, R, 128)."""
    B = cls_t.shape[0]

    if num_cores * rt_per_core > rt_blocks:
        # Core-split overflow tiles: clamp to the last real block (their
        # contribution is fully zeroed in-kernel by the global-index mask).
        def row_block(c, j):
            return jnp.minimum(c * rt_per_core + j, rt_blocks - 1)
    else:
        def row_block(c, j):
            return c * rt_per_core + j

    cls_spec = pl.BlockSpec((None, tile_rows, _LANE),
                            lambda c, b, j: (b, row_block(c, j), 0))
    geo_spec = pl.BlockSpec((None, 5, tile_rows, _LANE),
                            lambda c, b, j: (b, 0, row_block(c, j), 0))

    kernel = functools.partial(_detection_loss_kernel,
                               tile_rows=tile_rows, rt_per_core=rt_per_core,
                               hw_valid=hw_valid, needs_mask=needs_mask)

    return pl.pallas_call(
        kernel,
        out_shape=jax.ShapeDtypeStruct((num_cores, 8, _LANE), jnp.float32),
        grid_spec=pltpu.PrefetchScalarGridSpec(
            num_scalar_prefetch=0,
            grid=(num_cores, B, rt_per_core),
            in_specs=[cls_spec, cls_spec, cls_spec, geo_spec, geo_spec],
            out_specs=pl.BlockSpec((1, 8, _LANE), lambda c, b, j: (c, 0, 0)),
            scratch_shapes=[pltpu.VMEM((8, _LANE), jnp.float32)],
        ),
        compiler_params=pltpu.CompilerParams(
            dimension_semantics=("parallel", "arbitrary", "arbitrary")),
    )(cls_t, cls_p, msk, geo_t, geo_p)


def detection_loss(y_true_cls, y_pred_cls, y_true_geo, y_pred_geo, training_mask,
                   *, tile_rows_cap=512, num_cores=None):
    """Matches DetectionLoss.forward semantics.

    y_true_cls / y_pred_cls / training_mask : (B, 1, H, W)
    y_true_geo / y_pred_geo                 : (B, 5, H, W)
    Returns a float32 scalar.
    """
    B, _, H, W = y_true_cls.shape
    HW = H * W
    n_elem = B * 1 * HW   # element count of L_g * y_true_cls * mask (torch.mean divisor)

    sub = _sublane_multiple(y_true_cls, y_pred_cls, training_mask,
                            y_true_geo, y_pred_geo)
    rows_needed = _cdiv(HW, _LANE)
    rows_pad = _cdiv(rows_needed, sub) * sub        # only lane/sublane alignment
    pad = rows_pad * _LANE - HW                     # 0 for realistic feature maps

    tile_rows = min(tile_rows_cap, rows_pad)
    tile_rows = max(sub, (tile_rows // sub) * sub)
    rt_blocks = _cdiv(rows_pad, tile_rows)

    if num_cores is None:
        num_cores = _num_tensorcores()
    num_cores = max(1, min(int(num_cores), rt_blocks))
    rt_per_core = _cdiv(rt_blocks, num_cores)
    # Mask is only needed when the grid covers more rows than the (possibly
    # zero-padded) array; explicit zero pads contribute nothing by themselves.
    needs_mask = (num_cores * rt_per_core * tile_rows != rows_pad)

    def prep_cls(x):                          # (B, 1, H, W) -> (B, R, 128)
        x = x.reshape(B, HW)
        if pad:
            x = jnp.pad(x, ((0, 0), (0, pad)))
        return x.reshape(B, rows_pad, _LANE)

    def prep_geo(x):                          # (B, 5, H, W) -> (B, 5, R, 128)
        x = x.reshape(B, 5, HW)
        if pad:
            x = jnp.pad(x, ((0, 0), (0, 0), (0, pad)))
        return x.reshape(B, 5, rows_pad, _LANE)

    parts = _run_detection_kernel(
        prep_cls(y_true_cls), prep_cls(y_pred_cls), prep_cls(training_mask),
        prep_geo(y_true_geo), prep_geo(y_pred_geo),
        tile_rows=tile_rows, rt_blocks=rt_blocks, rt_per_core=rt_per_core,
        num_cores=num_cores, hw_valid=HW, needs_mask=needs_mask)  # (C, 8, 128)

    sums = jnp.sum(parts, axis=(0, 2))                            # (8,) f32
    intersection, sum_true, sum_pred, sum_lgw, nz = (
        sums[0], sums[1], sums[2], sums[3], sums[4])

    eps = 1e-05
    dice_loss = 1.0 - 2.0 * intersection / (sum_true + sum_pred + eps)
    classification_loss = dice_loss * 0.01

    mean_lgw_all = sum_lgw / jnp.float32(n_elem)
    return jnp.where(nz == 0.0,
                     10.0 * mean_lgw_all + classification_loss,
                     sum_lgw / jnp.maximum(nz, 1.0) + classification_loss)


def _detection_loss_ref(y_true_cls, y_pred_cls, y_true_geo, y_pred_geo, training_mask):
    """Pure-JAX mirror of the PyTorch DetectionLoss.forward, for verification."""
    eps = 1e-05
    intersection = jnp.sum(y_true_cls * y_pred_cls * training_mask)
    union = (jnp.sum(y_true_cls * training_mask)
             + jnp.sum(y_pred_cls * training_mask) + eps)
    cls_loss = (1.0 - 2.0 * intersection / union) * 0.01
    d1_gt, d2_gt, d3_gt, d4_gt, th_gt = jnp.split(y_true_geo, 5, axis=1)
    d1_p, d2_p, d3_p, d4_p, th_p = jnp.split(y_pred_geo, 5, axis=1)
    area_gt = (d1_gt + d3_gt) * (d2_gt + d4_gt)
    area_p = (d1_p + d3_p) * (d2_p + d4_p)
    w_union = jnp.minimum(d2_gt, d2_p) + jnp.minimum(d4_gt, d4_p)
    h_union = jnp.minimum(d1_gt, d1_p) + jnp.minimum(d3_gt, d3_p)
    area_int = w_union * h_union
    area_uni = area_gt + area_p - area_int
    l_aabb = -jnp.log((area_int + 1.0) / (area_uni + 1.0))
    l_theta = 1.0 - jnp.cos(th_p - th_gt)
    l_g = l_aabb + 20.0 * l_theta
    w = y_true_cls * training_mask
    nz = jnp.sum((w != 0).astype(jnp.float32))
    return jnp.where(nz == 0.0,
                     10.0 * jnp.mean(l_g * w) + cls_loss,
                     jnp.sum(l_g * w) / jnp.maximum(nz, 1.0) + cls_loss)


class FOTSLossPallas:
    """Pallas implementation of FOTSLoss forward (detection hot path in-kernel)."""

    def __init__(self, config):
        self.mode = config['mode']

    def __call__(self, y_true_cls, y_pred_cls, y_true_geo, y_pred_geo,
                 y_true_recog, y_pred_recog, training_mask):
        recognition_loss = jnp.zeros((1,), jnp.float32)
        det = jnp.zeros((), jnp.float32)

        if self.mode == 'recognition':
            # TODO(synk): CTCLoss (dynamic-programming alignment) has no clean Pallas TPU
            # equivalent here; recognition loss left at 0.
            pass
        elif self.mode == 'detection':
            det = detection_loss(y_true_cls, y_pred_cls, y_true_geo,
                                 y_pred_geo, training_mask)
        elif self.mode == 'united':
            det = detection_loss(y_true_cls, y_pred_cls, y_true_geo,
                                 y_pred_geo, training_mask)
            # TODO(synk): recognition (CTC) branch not implemented in Pallas.
        return det, recognition_loss


if __name__ == "__main__":
    def make_inputs(key, B, H, W):
        k1, k2, k3, k4, k5 = jax.random.split(key, 5)
        y_true_cls = (jax.random.uniform(k1, (B, 1, H, W)) > 0.5).astype(jnp.float32)
        y_pred_cls = jax.random.uniform(k2, (B, 1, H, W), dtype=jnp.float32)
        training_mask = (jax.random.uniform(k3, (B, 1, H, W)) > 0.2).astype(jnp.float32)
        y_true_geo = jax.random.uniform(k4, (B, 5, H, W), dtype=jnp.float32) * 8.0
        y_pred_geo = jax.random.uniform(k5, (B, 5, H, W), dtype=jnp.float32) * 8.0
        return y_true_cls, y_pred_cls, y_true_geo, y_pred_geo, training_mask

    # Case 1: module-level forward, small exactly-tiling shapes (no pad, no mask).
    tc, pc, tg, pg, msk = make_inputs(jax.random.PRNGKey(0), 2, 16, 16)
    loss_fn = FOTSLossPallas({'mode': 'detection'})
    det, rec = loss_fn(tc, pc, tg, pg, None, None, msk)
    det = jax.block_until_ready(det)
    jax.block_until_ready(rec)
    ref = jax.block_until_ready(_detection_loss_ref(tc, pc, tg, pg, msk))
    assert jnp.allclose(det, ref, rtol=2e-4, atol=2e-4), (det, ref)

    # Case 2: exercise in-kernel tail masking, forced 2-way core split and
    # clamped overflow tile (40 rows, 16-row tiles -> 3 blocks over 2 "cores").
    tc2, pc2, tg2, pg2, msk2 = make_inputs(jax.random.PRNGKey(1), 2, 40, 128)
    det2 = jax.block_until_ready(
        detection_loss(tc2, pc2, tg2, pg2, msk2, tile_rows_cap=16, num_cores=2))
    ref2 = jax.block_until_ready(_detection_loss_ref(tc2, pc2, tg2, pg2, msk2))
    assert jnp.allclose(det2, ref2, rtol=2e-4, atol=2e-4), (det2, ref2)

    # Case 3: exercise the lane zero-pad path (H*W not a multiple of 128).
    tc3, pc3, tg3, pg3, msk3 = make_inputs(jax.random.PRNGKey(2), 1, 10, 20)
    det3 = jax.block_until_ready(detection_loss(tc3, pc3, tg3, pg3, msk3))
    ref3 = jax.block_until_ready(_detection_loss_ref(tc3, pc3, tg3, pg3, msk3))
    assert jnp.allclose(det3, ref3, rtol=2e-4, atol=2e-4), (det3, ref3)

    print("KERNEL_OK")
</pallas_src>

<mosaic_0001>
module attributes {stable_mosaic.version = 11 : i64} {
  func.func @_detection_loss_kernel(%arg0: i32, %arg1: i32, %arg2: i32, %arg3: memref<1x8x128xf32, #tpu.memory_space<vmem>>, %arg4: memref<1x8x128xf32, #tpu.memory_space<vmem>>, %arg5: memref<1x8x128xf32, #tpu.memory_space<vmem>>, %arg6: memref<1x5x8x128xf32, #tpu.memory_space<vmem>>, %arg7: memref<1x5x8x128xf32, #tpu.memory_space<vmem>>, %arg8: memref<1x8x128xf32, #tpu.memory_space<vmem>>, %arg9: memref<8x128xf32, #tpu.memory_space<vmem>>) attributes {dimension_semantics = [#tpu.dimension_semantics<parallel>, #tpu.dimension_semantics<arbitrary>, #tpu.dimension_semantics<arbitrary>], iteration_bounds = array<i64: 1, 2, 1>, scalar_prefetch = 0 : i64, scratch_operands = 1 : i64, tpu.core_type = #tpu.core_type<tc>, window_params = [{transform_indices = @transform_0, window_bounds = array<i64: 1, 8, 128>}, {transform_indices = @transform_1, window_bounds = array<i64: 1, 8, 128>}, {transform_indices = @transform_2, window_bounds = array<i64: 1, 8, 128>}, {transform_indices = @transform_3, window_bounds = array<i64: 1, 5, 8, 128>}, {transform_indices = @transform_4, window_bounds = array<i64: 1, 5, 8, 128>}, {transform_indices = @transform_5, window_bounds = array<i64: 1, 8, 128>}]} {
    %c0_i32 = arith.constant 0 : i32
    %0 = arith.cmpi eq, %arg1, %c0_i32 : i32
    %c0_i32_0 = arith.constant 0 : i32
    %1 = arith.cmpi eq, %arg2, %c0_i32_0 : i32
    %2 = arith.andi %0, %1 : i1
    %c1_i32 = arith.constant 1 : i32
    %3 = arith.cmpi eq, %arg1, %c1_i32 : i32
    %c0_i32_1 = arith.constant 0 : i32
    %4 = arith.cmpi eq, %arg2, %c0_i32_1 : i32
    %5 = arith.andi %3, %4 : i1
    %6 = arith.extui %2 : i1 to i32
    %c0_i32_2 = arith.constant 0 : i32
    %7 = arith.cmpi ne, %6, %c0_i32_2 : i32
    scf.if %7 {
      %cst_62 = arith.constant 0.000000e+00 : f32
      %88 = vector.broadcast %cst_62 : f32 to vector<8x128xf32>
      %c0_63 = arith.constant 0 : index
      %c0_64 = arith.constant 0 : index
      %89 = vector.load %arg9[%c0_63, %c0_64] : memref<8x128xf32, #tpu.memory_space<vmem>>, vector<8x128xf32>
      tpu.vector_store %arg9[%c0_63, %c0_64], %88 {strides = array<i32>} : memref<8x128xf32, #tpu.memory_space<vmem>>, vector<8x128xf32>,
    } else {
    }
    %c0 = arith.constant 0 : index
    %c0_3 = arith.constant 0 : index
    %c0_4 = arith.constant 0 : index
    %8 = vector.load %arg3[%c0, %c0_3, %c0_4] : memref<1x8x128xf32, #tpu.memory_space<vmem>>, vector<1x8x128xf32>
    %9 = vector.shape_cast %8 : vector<1x8x128xf32> to vector<8x128xf32>
    %c0_5 = arith.constant 0 : index
    %c0_6 = arith.constant 0 : index
    %c0_7 = arith.constant 0 : index
    %10 = vector.load %arg4[%c0_5, %c0_6, %c0_7] : memref<1x8x128xf32, #tpu.memory_space<vmem>>, vector<1x8x128xf32>
    %11 = vector.shape_cast %10 : vector<1x8x128xf32> to vector<8x128xf32>
    %c0_8 = arith.constant 0 : index
    %c0_9 = arith.constant 0 : index
    %c0_10 = arith.constant 0 : index
    %12 = vector.load %arg5[%c0_8, %c0_9, %c0_10] : memref<1x8x128xf32, #tpu.memory_space<vmem>>, vector<1x8x128xf32>
    %13 = vector.shape_cast %12 : vector<1x8x128xf32> to vector<8x128xf32>
    %c0_11 = arith.constant 0 : index
    %c0_12 = arith.constant 0 : index
    %c0_13 = arith.constant 0 : index
    %c0_14 = arith.constant 0 : index
    %14 = vector.load %arg6[%c0_11, %c0_12, %c0_13, %c0_14] : memref<1x5x8x128xf32, #tpu.memory_space<vmem>>, vector<1x1x8x128xf32>
    %15 = vector.shape_cast %14 : vector<1x1x8x128xf32> to vector<8x128xf32>
    %c0_15 = arith.constant 0 : index
    %c1 = arith.constant 1 : index
    %c0_16 = arith.constant 0 : index
    %c0_17 = arith.constant 0 : index
    %16 = vector.load %arg6[%c0_15, %c1, %c0_16, %c0_17] : memref<1x5x8x128xf32, #tpu.memory_space<vmem>>, vector<1x1x8x128xf32>
    %17 = vector.shape_cast %16 : vector<1x1x8x128xf32> to vector<8x128xf32>
    %c0_18 = arith.constant 0 : index
    %c2 = arith.constant 2 : index
    %c0_19 = arith.constant 0 : index
    %c0_20 = arith.constant 0 : index
    %18 = vector.load %arg6[%c0_18, %c2, %c0_19, %c0_20] : memref<1x5x8x128xf32, #tpu.memory_space<vmem>>, vector<1x1x8x128xf32>
    %19 = vector.shape_cast %18 : vector<1x1x8x128xf32> to vector<8x128xf32>
    %c0_21 = arith.constant 0 : index
    %c3 = arith.constant 3 : index
    %c0_22 = arith.constant 0 : index
    %c0_23 = arith.constant 0 : index
    %20 = vector.load %arg6[%c0_21, %c3, %c0_22, %c0_23] : memref<1x5x8x128xf32, #tpu.memory_space<vmem>>, vector<1x1x8x128xf32>
    %21 = vector.shape_cast %20 : vector<1x1x8x128xf32> to vector<8x128xf32>
    %c0_24 = arith.constant 0 : index
    %c4 = arith.constant 4 : index
    %c0_25 = arith.constant 0 : index
    %c0_26 = arith.constant 0 : index
    %22 = vector.load %arg6[%c0_24, %c4, %c0_25, %c0_26] : memref<1x5x8x128xf32, #tpu.memory_space<vmem>>, vector<1x1x8x128xf32>
    %23 = vector.shape_cast %22 : vector<1x1x8x128xf32> to vector<8x128xf32>
    %c0_27 = arith.constant 0 : index
    %c0_28 = arith.constant 0 : index
    %c0_29 = arith.constant 0 : index
    %c0_30 = arith.constant 0 : index
    %24 = vector.load %arg7[%c0_27, %c0_28, %c0_29, %c0_30] : memref<1x5x8x128xf32, #tpu.memory_space<vmem>>, vector<1x1x8x128xf32>
    %25 = vector.shape_cast %24 : vector<1x1x8x128xf32> to vector<8x128xf32>
    %c0_31 = arith.constant 0 : index
    %c1_32 = arith.constant 1 : index
    %c0_33 = arith.constant 0 : index
    %c0_34 = arith.constant 0 : index
    %26 = vector.load %arg7[%c0_31, %c1_32, %c0_33, %c0_34] : memref<1x5x8x128xf32, #tpu.memory_space<vmem>>, vector<1x1x8x128xf32>
    %27 = vector.shape_cast %26 : vector<1x1x8x128xf32> to vector<8x128xf32>
    %c0_35 = arith.constant 0 : index
    %c2_36 = arith.constant 2 : index
    %c0_37 = arith.constant 0 : index
    %c0_38 = arith.constant 0 : index
    %28 = vector.load %arg7[%c0_35, %c2_36, %c0_37, %c0_38] : memref<1x5x8x128xf32, #tpu.memory_space<vmem>>, vector<1x1x8x128xf32>
    %29 = vector.shape_cast %28 : vector<1x1x8x128xf32> to vector<8x128xf32>
    %c0_39 = arith.constant 0 : index
    %c3_40 = arith.constant 3 : index
    %c0_41 = arith.constant 0 : index
    %c0_42 = arith.constant 0 : index
    %30 = vector.load %arg7[%c0_39, %c3_40, %c0_41, %c0_42] : memref<1x5x8x128xf32, #tpu.memory_space<vmem>>, vector<1x1x8x128xf32>
    %31 = vector.shape_cast %30 : vector<1x1x8x128xf32> to vector<8x128xf32>
    %c0_43 = arith.constant 0 : index
    %c4_44 = arith.constant 4 : index
    %c0_45 = arith.constant 0 : index
    %c0_46 = arith.constant 0 : index
    %32 = vector.load %arg7[%c0_43, %c4_44, %c0_45, %c0_46] : memref<1x5x8x128xf32, #tpu.memory_space<vmem>>, vector<1x1x8x128xf32>
    %33 = vector.shape_cast %32 : vector<1x1x8x128xf32> to vector<8x128xf32>
    %34 = arith.addf %15, %19 : vector<8x128xf32>
    %35 = arith.addf %17, %21 : vector<8x128xf32>
    %36 = arith.mulf %34, %35 : vector<8x128xf32>
    %37 = arith.addf %25, %29 : vector<8x128xf32>
    %38 = arith.addf %27, %31 : vector<8x128xf32>
    %39 = arith.mulf %37, %38 : vector<8x128xf32>
    %40 = arith.minimumf %17, %27 : vector<8x128xf32>
    %41 = arith.minimumf %21, %31 : vector<8x128xf32>
    %42 = arith.addf %40, %41 : vector<8x128xf32>
    %43 = arith.minimumf %15, %25 : vector<8x128xf32>
    %44 = arith.minimumf %19, %29 : vector<8x128xf32>
    %45 = arith.addf %43, %44 : vector<8x128xf32>
    %46 = arith.mulf %42, %45 : vector<8x128xf32>
    %47 = arith.addf %36, %39 : vector<8x128xf32>
    %48 = arith.subf %47, %46 : vector<8x128xf32>
    %cst = arith.constant 1.000000e+00 : f32
    %49 = vector.broadcast %cst : f32 to vector<8x128xf32>
    %50 = arith.addf %48, %49 : vector<8x128xf32>
    %51 = math.log %50 : vector<8x128xf32>
    %cst_47 = arith.constant 1.000000e+00 : f32
    %52 = vector.broadcast %cst_47 : f32 to vector<8x128xf32>
    %53 = arith.addf %46, %52 : vector<8x128xf32>
    %54 = math.log %53 : vector<8x128xf32>
    %55 = arith.subf %51, %54 : vector<8x128xf32>
    %56 = arith.subf %33, %23 : vector<8x128xf32>
    %57 = math.cos %56 : vector<8x128xf32>
    %cst_48 = arith.constant 1.000000e+00 : f32
    %58 = vector.broadcast %cst_48 : f32 to vector<8x128xf32>
    %59 = arith.subf %58, %57 : vector<8x128xf32>
    %cst_49 = arith.constant 2.000000e+01 : f32
    %60 = vector.broadcast %cst_49 : f32 to vector<8x128xf32>
    %61 = arith.mulf %60, %59 : vector<8x128xf32>
    %62 = arith.addf %55, %61 : vector<8x128xf32>
    %63 = arith.mulf %9, %13 : vector<8x128xf32>
    %64 = arith.mulf %63, %11 : vector<8x128xf32>
    %65 = arith.mulf %11, %13 : vector<8x128xf32>
    %66 = arith.mulf %62, %63 : vector<8x128xf32>
    %cst_50 = arith.constant 0.000000e+00 : f32
    %67 = vector.broadcast %cst_50 : f32 to vector<8x128xf32>
    %68 = arith.cmpf one, %63, %67 : vector<8x128xf32>
    %69 = arith.extui %68 : vector<8x128xi1> to vector<8x128xi32>
    %70 = arith.sitofp %69 : vector<8x128xi32> to vector<8x128xf32>
    %cst_51 = arith.constant dense<0.000000e+00> : vector<128xf32>
    %71 = vector.multi_reduction <add>, %64, %cst_51 [0] : vector<8x128xf32> to vector<128xf32>
    %72 = vector.shape_cast %71 : vector<128xf32> to vector<1x128xf32>
    %cst_52 = arith.constant dense<0.000000e+00> : vector<128xf32>
    %73 = vector.multi_reduction <add>, %63, %cst_52 [0] : vector<8x128xf32> to vector<128xf32>
    %74 = vector.shape_cast %73 : vector<128xf32> to vector<1x128xf32>
    %cst_53 = arith.constant dense<0.000000e+00> : vector<128xf32>
    %75 = vector.multi_reduction <add>, %65, %cst_53 [0] : vector<8x128xf32> to vector<128xf32>
    %76 = vector.shape_cast %75 : vector<128xf32> to vector<1x128xf32>
    %cst_54 = arith.constant dense<0.000000e+00> : vector<128xf32>
    %77 = vector.multi_reduction <add>, %66, %cst_54 [0] : vector<8x128xf32> to vector<128xf32>
    %78 = vector.shape_cast %77 : vector<128xf32> to vector<1x128xf32>
    %cst_55 = arith.constant dense<0.000000e+00> : vector<128xf32>
    %79 = vector.multi_reduction <add>, %70, %cst_55 [0] : vector<8x128xf32> to vector<128xf32>
    %80 = vector.shape_cast %79 : vector<128xf32> to vector<1x128xf32>
    %cst_56 = arith.constant 0.000000e+00 : f32
    %81 = vector.broadcast %cst_56 : f32 to vector<3x128xf32>
    %82 = tpu.concatenate %72, %74, %76, %78, %80, %81 in 0 : vector<1x128xf32>, vector<1x128xf32>, vector<1x128xf32>, vector<1x128xf32>, vector<1x128xf32>, vector<3x128xf32> -> vector<8x128xf32>
    %c0_57 = arith.constant 0 : index
    %c0_58 = arith.constant 0 : index
    %83 = vector.load %arg9[%c0_57, %c0_58] : memref<8x128xf32, #tpu.memory_space<vmem>>, vector<8x128xf32>
    %84 = arith.addf %83, %82 : vector<8x128xf32>
    %c0_59 = arith.constant 0 : index
    %c0_60 = arith.constant 0 : index
    %85 = vector.load %arg9[%c0_59, %c0_60] : memref<8x128xf32, #tpu.memory_space<vmem>>, vector<8x128xf32>
    tpu.vector_store %arg9[%c0_59, %c0_60], %84 {strides = array<i32>} : memref<8x128xf32, #tpu.memory_space<vmem>>, vector<8x128xf32>,
    %86 = arith.extui %5 : i1 to i32
    %c0_i32_61 = arith.constant 0 : i32
    %87 = arith.cmpi ne, %86, %c0_i32_61 : i32
    scf.if %87 {
      %c0_62 = arith.constant 0 : index
      %c0_63 = arith.constant 0 : index
      %88 = vector.load %arg9[%c0_62, %c0_63] : memref<8x128xf32, #tpu.memory_space<vmem>>, vector<8x128xf32>
      %c0_64 = arith.constant 0 : index
      %c0_65 = arith.constant 0 : index
      %c0_66 = arith.constant 0 : index
      %89 = vector.load %arg8[%c0_64, %c0_65, %c0_66] : memref<1x8x128xf32, #tpu.memory_space<vmem>>, vector<1x8x128xf32>
      %90 = vector.shape_cast %89 : vector<1x8x128xf32> to vector<8x128xf32>
      %91 = vector.shape_cast %88 : vector<8x128xf32> to vector<1x8x128xf32>
      tpu.vector_store %arg8[%c0_64, %c0_65, %c0_66], %91 {strides = array<i32>} : memref<1x8x128xf32, #tpu.memory_space<vmem>>, vector<1x8x128xf32>,
    } else {
    }
    return
  }
  func.func @transform_0(%arg0: i32, %arg1: i32, %arg2: i32) -> (i32, i32, i32) {
    %c1_i32 = arith.constant 1 : i32
    %0 = arith.muli %arg0, %c1_i32 : i32
    %1 = arith.addi %0, %arg2 : i32
    %c0_i32 = arith.constant 0 : i32
    %c0_i32_0 = arith.constant 0 : i32
    return %arg1, %1, %c0_i32 : i32, i32, i32
  }
  func.func @transform_1(%arg0: i32, %arg1: i32, %arg2: i32) -> (i32, i32, i32) {
    %c1_i32 = arith.constant 1 : i32
    %0 = arith.muli %arg0, %c1_i32 : i32
    %1 = arith.addi %0, %arg2 : i32
    %c0_i32 = arith.constant 0 : i32
    %c0_i32_0 = arith.constant 0 : i32
    return %arg1, %1, %c0_i32 : i32, i32, i32
  }
  func.func @transform_2(%arg0: i32, %arg1: i32, %arg2: i32) -> (i32, i32, i32) {
    %c1_i32 = arith.constant 1 : i32
    %0 = arith.muli %arg0, %c1_i32 : i32
    %1 = arith.addi %0, %arg2 : i32
    %c0_i32 = arith.constant 0 : i32
    %c0_i32_0 = arith.constant 0 : i32
    return %arg1, %1, %c0_i32 : i32, i32, i32
  }
  func.func @transform_3(%arg0: i32, %arg1: i32, %arg2: i32) -> (i32, i32, i32, i32) {
    %c1_i32 = arith.constant 1 : i32
    %0 = arith.muli %arg0, %c1_i32 : i32
    %1 = arith.addi %0, %arg2 : i32
    %c0_i32 = arith.constant 0 : i32
    %c0_i32_0 = arith.constant 0 : i32
    %c0_i32_1 = arith.constant 0 : i32
    return %arg1, %c0_i32, %1, %c0_i32_0 : i32, i32, i32, i32
  }
  func.func @transform_4(%arg0: i32, %arg1: i32, %arg2: i32) -> (i32, i32, i32, i32) {
    %c1_i32 = arith.constant 1 : i32
    %0 = arith.muli %arg0, %c1_i32 : i32
    %1 = arith.addi %0, %arg2 : i32
    %c0_i32 = arith.constant 0 : i32
    %c0_i32_0 = arith.constant 0 : i32
    %c0_i32_1 = arith.constant 0 : i32
    return %arg1, %c0_i32, %1, %c0_i32_0 : i32, i32, i32, i32
  }
  func.func @transform_5(%arg0: i32, %arg1: i32, %arg2: i32) -> (i32, i32, i32) {
    %c0_i32 = arith.constant 0 : i32
    %c0_i32_0 = arith.constant 0 : i32
    %c0_i32_1 = arith.constant 0 : i32
    return %arg0, %c0_i32, %c0_i32_0 : i32, i32, i32
  }
}

</mosaic_0001>

<bundles_post_ra>
// kernel: tpu_custom_call.1
= control target key start
LH: loop header
LB: loop body
LE: loop exit
PB: predicated region body
PF: predicated region fallthrough
CT: control target
= control target key end

     0   :  { %s1541_s0 = inlined_call_operand.hbm [shape: f32[2,8,128], index: 0, kind: input, shape index: {}]   ;;  %s1542_s1 = inlined_call_operand.hbm [shape: f32[2,8,128], index: 1, kind: input, shape index: {}]   ;;  %s1543_s2 = inlined_call_operand.hbm [shape: f32[2,8,128], index: 2, kind: input, shape index: {}]   ;;  %s1544_s3 = inlined_call_operand.hbm [shape: f32[2,5,8,128], index: 3, kind: input, shape index: {}]   ;;  %s1545_s4 = inlined_call_operand.hbm [shape: f32[2,5,8,128], index: 4, kind: input, shape index: {}]   ;;  %s1546_s5 = inlined_call_operand.hbm [shape: f32[1,8,128], index: 5, kind: output, shape index: {}]  }
   0x1   :  { %1553 = sst [smem:[#allocation23_spill]] %s1541_s0 }
   0x2   :  { %1554 = sst [smem:[#allocation24_spill]] %s1542_s1 }
   0x3   :  { %1555 = sst [smem:[#allocation25_spill]] %s1544_s3 }
   0x4   :  { %1556 = sst [smem:[#allocation26_spill]] %s1546_s5 }
   0x5   :  { %10 = vsyncpa [#allocation4], 0 }
   0x6   :  { %12 = vsyncpa [#allocation4 + $0x1], 0 }
   0x7   :  { %13 = vsyncpa [#allocation7], 0 }
   0x8   :  { %15 = vsyncpa [#allocation7 + $0x1], 0 }
   0x9   :  { %16 = vsyncpa [#allocation10], 0 }
   0xa   :  { %18 = vsyncpa [#allocation10 + $0x1], 0 }
   0xb   :  { %19 = vsyncpa [#allocation5], 0  ;;  %s1304_s18 = smov 0   ;;  %s1306_s19 = smov 0  }
   0xc   :  { %s1308_s20 = smov 0   ;;  %s1310_s21 = smov 0  }
   0xd   :  { %s1312_s22 = smov 0   ;;  %s1314_s23 = smov 0  }
   0xe LB: > { %1557 = sst [smem:[#allocation17_spill]] %s1248_s20  ;;  %s1333_s24 = sadd.s32 4294967295, %s1260_s23   ;;  %s1260_s23 = sphi %s1314_s23, %s25_s23   ;;  %s1256_s22 = sphi %s1312_s22, %s1579_s22   ;;  %s1252_s21 = sphi %s1310_s21, %s1578_s21   ;;  %s1248_s20 = sphi %s1308_s20, %s1577_s20   ;;  %s1244_s19 = sphi %s1306_s19, %s1581_s19   ;;  %s1240_s18 = sphi %s1304_s18, %s1580_s18  }
   0xf   : > { %1558 = sst [smem:[#allocation18_spill]] %s1252_s21  ;;  %s40_s25 = sadd.s32 1, %s1256_s22 }
  0x10   : > { %1559 = sst [smem:[#allocation19_spill]] %s1256_s22  ;;  %p42_p0 = scmp.ge.s32.totalorder %s40_s25, 2 }
  0x11   : > { %1560 = sst [smem:[#allocation20_spill]] %s1260_s23  ;;  %s55_s26 = sadd.s32 1, %s1248_s20 }
  0x12   : > { %p62_p1 = scmp.ne.s32.totalorder %s1248_s20, %s1244_s19  ;;  %p63_p2 = scmp.eq.s32.totalorder %s1260_s23, 0 }
  0x13   : > { %s1583_s25 = smov (%p42_p0, %s40_s25), 0  ;;  %p68_p4 = scmp.ne.s32.totalorder %s1244_s19, %s1240_s18 }
  0x14   : > { %1561 = sst [smem:[#allocation21_spill]] %s1583_s25  ;;  %p64_p3 = por %p63_p2, %p62_p1 }
  0x15   : > { %s50_s27 = ssub.s32 %s1256_s22, %s1583_s25  ;;  %p69_p5 = scmp.eq.s32.totalorder %s1333_s24, 0 }
  0x16   : > { %p53_p6 = scmp.eq.s32.totalorder %s50_s27, 0  ;;  %p953_p8 = scmp.lt.s32.totalorder %s1260_s23, 2 }
  0x17   : > { %p1346_p7 = por %p69_p5, %p68_p4  ;;  %s1355_s30 = sand.u32 1, %s1248_s20  }
  0x18   : > { %s1352_s29 = scalar_select %p53_p6, %s1248_s20, %s55_s26  }
  0x19   : > { %s1358_s6 = sshll.u32 %s1256_s22, 3  ;;  %s1361_s7 = sshll.u32 %s1355_s30, 3 }
  0x1a   : > { %1563 = sst [smem:[#allocation22_spill]] %s1352_s29  ;;  %p1363_p9 = pnand %p953_p8, %p64_p3 }
  0x1b   : > { %s259_s9 = sand.u32 1, %s1260_s23   ;;  %s1565_s1 = sld [smem:[#allocation24_spill]] }
  0x1c   : > { %s263_s13 = scalar_lea.vmem [#allocation6], %s1361_s7  ;;  %s1373_s16 = scalar_lea.sflag [#allocation7], %s259_s9 }
  0x1d   : > { %s273_s14 = sshll.u32 %s263_s13, 4  ;;  %s1548_s17 = smul.u32 40, %s1355_s30  ;;  %s274_s14 = int_to_ptr.vmem [resolvable:$true] %s273_s14 }
  0x1e   : > { %p894_p10 = scmp.ge.s32.totalorder %s1260_s23, 1  ;;  %p347_p11 = scmp.lt.s32.totalorder %s1260_s23, 3 }
  0x1f   : > { %s919_s18 = smul.u32 40, %s1256_s22  ;;  %s1567_s3 = sld [smem:[#allocation25_spill]] }
  0x20   : > { %p1382_p12 = pnand %p894_p10, %p347_p11  ;;  %s305_s13 = scalar_lea.vmem [#allocation9], %s1548_s17 }
  0x21   : > { %s269_s12 = scalar_lea.hbm %s1565_s1, %s1358_s6  ;;  %s1262_s1 = smov 128  }
  0x22   : > { %s271_s15 = sshll.u32 %s269_s12, 4  ;;  %s1263_s25 = smov 8   ;;  %s272_s15 = int_to_ptr.hbm [resolvable:$true] %s271_s15 }
  0x23   : > { %943 = dma.hbm_to_vmem [thread:$0]  (!%p1363_p9), %s272_s15, 128, %s274_s14, %s1373_s16  }
  0x24   : > { %s315_s14 = sshll.u32 %s305_s13, 4  ;;  %s1391_s15 = scalar_lea.sflag [#allocation10], %s259_s9  ;;  %s316_s14 = int_to_ptr.vmem [resolvable:$true] %s315_s14 }
  0x25   : > { %s312_s11 = scalar_lea.hbm %s1567_s3, %s919_s18  ;;  %s1568_s0 = sld [smem:[#allocation23_spill]] }
  0x26   : > { %s313_s12 = sshll.u32 %s312_s11, 4  ;;  %s242_s17 = scalar_lea.vmem [#allocation3], %s1361_s7  ;;  %s314_s12 = int_to_ptr.hbm [resolvable:$true] %s313_s12 }
  0x27   : > { %949 = dma.hbm_to_vmem [thread:$0]  (!%p1363_p9), %s314_s12, 640, %s316_s14, %s1391_s15, %s1262_s1, %s1262_s1, %s1263_s25  }
  0x28   : > { %s252_s13 = sshll.u32 %s242_s17, 4  ;;  %s239_s9 = scalar_lea.sflag [#allocation4], %s1355_s30  ;;  %s253_s13 = int_to_ptr.vmem [resolvable:$true] %s252_s13 }
  0x29   : > { %s290_s20 = scalar_lea.hbm %s1543_s2, %s1358_s6  ;;  %s284_s14 = scalar_lea.vmem [#allocation8], %s1361_s7 }
  0x2a   : > { %s292_s12 = sshll.u32 %s290_s20, 4  ;;  %s294_s23 = sshll.u32 %s284_s14, 4  ;;  %s293_s12 = int_to_ptr.hbm [resolvable:$true] %s292_s12  ;;  %s295_s23 = int_to_ptr.vmem [resolvable:$true] %s294_s23 }
  0x2b   : > { %s248_s11 = scalar_lea.hbm %s1568_s0, %s1358_s6  ;;  %s336_s10 = scalar_lea.hbm %s1545_s4, %s919_s18 }
  0x2c   : > { %s250_s3 = sshll.u32 %s248_s11, 4  ;;  %s337_s11 = sshll.u32 %s336_s10, 4  ;;  %s251_s3 = int_to_ptr.hbm [resolvable:$true] %s250_s3  ;;  %s338_s11 = int_to_ptr.hbm [resolvable:$true] %s337_s11 }
  0x2d   : > { %940 = dma.hbm_to_vmem [thread:$0]  (!%p1363_p9), %s251_s3, 128, %s253_s13, %s239_s9  }
  0x2e   : > { %946 = dma.hbm_to_vmem [thread:$0]  (!%p1363_p9), %s293_s12, 128, %s295_s23, %s1373_s16  }
  0x2f   : > { %s1569_s0 = smul.u32 40, %s1355_s30  ;;  %s353_s3 = sand.u32 (!%p1382_p12), 1, %s1244_s19  }
  0x30   : > { %351 = sbr.rel (%p1382_p12) target bundleno = 217 (0xd9), region = 40  ;;  %s1423_s20 = sshll.u32 (!%p1382_p12), %s353_s3, 3 }
  0x31   : > { %s329_s5 = scalar_lea.vmem [#allocation11], %s1569_s0  ;;  %s354_s22 = scalar_lea.sflag (!%p1382_p12), [#allocation4], %s353_s3 }
  0x32   : > { %s339_s21 = sshll.u32 %s329_s5, 4  ;;  %s357_s23 = scalar_lea.vmem (!%p1382_p12), [#allocation3], %s1423_s20  ;;  %s340_s21 = int_to_ptr.vmem [resolvable:$true] %s339_s21 }
  0x33   : > { %952 = dma.hbm_to_vmem [thread:$0]  (!%p1363_p9), %s338_s11, 640, %s340_s21, %s1391_s15, %s1262_s1, %s1262_s1, %s1263_s25  }
  0x35   : > { %1223 = dma.done.wait (%p1346_p7), %s354_s22, 128  }
  0x36   : > { %1225 = vsyncadd (%p1346_p7), %s354_s22, 4294967168  ;;  %s363_s0 = sand.u32 1, %s1333_s24   ;;  %s367_s5 = scalar_lea.vmem [#allocation6], %s1423_s20 }
  0x37   : > { %s364_s1 = scalar_lea.sflag [#allocation7], %s363_s0 }
  0x38   : > { %1227 = dma.done.wait (%p1346_p7), %s364_s1, 256  }
  0x39   : > { %1229 = vsyncadd (%p1346_p7), %s364_s1, 4294967040  ;;  %s922_s21 = smul.u32 40, %s353_s3  ;;  %s377_s25 = scalar_lea.vmem [#allocation8], %s1423_s20 }
  0x3a   : > { %s384_s29 = scalar_lea.sflag [#allocation10], %s363_s0 }
  0x3b   : > { %s1437_s30 = scalar_lea.vmem [#allocation9], %s922_s21 }
  0x3c   : > { %1231 = dma.done.wait (%p1346_p7), %s384_s29, 1280  }
  0x3d   : > { %1233 = vsyncadd (%p1346_p7), %s384_s29, 4294966016  ;;  %s1570_s6 = sld [smem:[#allocation18_spill]]  ;;  %s1445_s7 = scalar_lea.vmem [#allocation11], %s922_s21 }
  0x43   : > { %p445_p13 = scmp.eq.s32.totalorder %s1570_s6, 0  ;;  %p449_p0 = scmp.eq.s32.totalorder %s1570_s6, 1 }
  0x44   : > { %v1264_v0 = vmov (%p445_p13), 0.0  }
  0x45   : > { %453 = sbr.rel (!%p445_p13) target bundleno = 74 (0x4a), region = 64  ;;  %454 = vst [vmem:[#allocation2] sm:$0xff] (%p445_p13), %v1264_v0 }
  0x4a PF: > { %v903_v1 = vld [vmem:[%s1437_s30 + $0x20] sm:$0xff]  ;;  %v907_v2 = vld [vmem:[%s1445_s7 + $0x20] sm:$0xff]  ;;  %v1265_v15 = vmov 683565275   ;;  %v1266_v17 = vmov 2475754826  }
  0x4b   : > { %v1449_v3 = vsub.f32 %v907_v2, %v903_v1  ;;  %v1267_v19 = vmov 2131351028   ;;  %v1268_v21 = vmov 2102212464   ;;  %v1269_v23 = vmov 920167782  }
  0x4c   : > { %v1270_v29 = vmov 1326507024  }
  0x4d   : > { %v502_v4 = vand.u32 2139095040, %v1449_v3  ;;  %v499_v6 = vand.u32 2147483647, %v1449_v3  ;;  %vm501_vm12 = vcmp.lt.s32.totalorder %v1449_v3, 0 }
  0x4f   : > { %v503_v5 = vshrl.u32 %v502_v4, 23  ;;  %v506_v9 = vand.u32 8388607, %v499_v6  ;;  %v1271_v4 = vmov 0   ;;  %vm1501_vm13 = vcmp.le.f32.partialorder %v499_v6, 0.7853982 }
  0x51   : > { %v908_v7 = vadd.s32 4294967169, %v503_v5  ;;  %v507_v12 = vor.u32 8388608, %v506_v9 }
  0x53   : > { %v509_v8 = vadd.s32 1, %v908_v7  ;;  %v1458_v34 = vshll.u32 %v507_v12, 8 }
  0x55   : > { %vm510_vm0 = vcmp.gt.s32.totalorder %v509_v8, 0  ;;  %v548_v43 = vand.u32 65535, %v1458_v34  ;;  %v549_v44 = vshrl.u32 %v1458_v34, 16 }
  0x56   : > { %v511_v10 = vsel %vm510_vm0, %v509_v8, 0 }
  0x57   : > { %v513_v11 = vand.u32 31, %v511_v10  ;;  %v1455_v13 = vshrl.u32 %v511_v10, 5 }
  0x59   : > { %v514_v14 = vsub.s32 32, %v513_v11  ;;  %v516_v16 = vshll.u32 %v1265_v15, %v513_v11  ;;  %v519_v18 = vshll.u32 %v1266_v17, %v513_v11  ;;  %v522_v20 = vshll.u32 %v1267_v19, %v513_v11 }
  0x5a   : > { %v525_v22 = vshll.u32 %v1268_v21, %v513_v11  ;;  %v528_v24 = vshll.u32 %v1269_v23, %v513_v11  ;;  %vm531_vm1 = vcmp.lt.s32.totalorder %v1455_v13, 1  ;;  %vm533_vm2 = vcmp.lt.s32.totalorder %v1455_v13, 3 }
  0x5b   : > { %v517_v25 = vshrl.u32 %v1266_v17, %v514_v14  ;;  %v520_v26 = vshrl.u32 %v1267_v19, %v514_v14  ;;  %v523_v27 = vshrl.u32 %v1268_v21, %v514_v14  ;;  %v526_v28 = vshrl.u32 %v1269_v23, %v514_v14 }
  0x5c   : > { %v529_v30 = vshrl.u32 %v1270_v29, %v514_v14  ;;  %vm534_vm3 = vcmp.lt.s32.totalorder %v1455_v13, 4  ;;  %vm532_vm4 = vcmp.lt.s32.totalorder %v1455_v13, 2  ;;  %v515_v51 = vshrl.u32 %v1265_v15, %v514_v14 }
  0x5d   : > { %v518_v31 = vor.u32 %v517_v25, %v516_v16  ;;  %v521_v32 = vor.u32 %v520_v26, %v519_v18  ;;  %v524_v33 = vor.u32 %v523_v27, %v522_v20  ;;  %v527_v35 = vor.u32 %v526_v28, %v525_v22 }
  0x5e   : > { %v530_v36 = vor.u32 %v529_v30, %v528_v24 }
  0x5f   : > { %v539_v37 = vsel %vm531_vm1, %v518_v31, %v521_v32  ;;  %v543_v38 = vsel %vm531_vm1, %v521_v32, %v524_v33  ;;  %v540_v39 = vsel %vm534_vm3, %v527_v35, 920167782  ;;  %v535_v0 = vsel %vm531_vm1, %v515_v51, %v518_v31 }
  0x60   : > { %v544_v40 = vsel %vm534_vm3, %v530_v36, 1326507024  ;;  %v541_v41 = vsel %vm533_vm2, %v524_v33, %v540_v39  ;;  %v536_v2 = vsel %vm534_vm3, %v524_v33, 2102212464  ;;  %v900_v39 = vld [vmem:[%s1437_s30 + $0x8] sm:$0xff]  ;;  %vm693_vm3 = vcmask 1040384  }
  0x61   : > { %v545_v42 = vsel %vm533_vm2, %v527_v35, %v544_v40  ;;  %v542_v45 = vsel %vm532_vm4, %v539_v37, %v541_v41  ;;  %v537_v15 = vsel %vm533_vm2, %v521_v32, %v536_v2  ;;  %v901_v41 = vld [vmem:[%s1437_s30 + $0x10] sm:$0xff]  ;;  %vm642_vm2 = vweird.f32 %v1449_v3 }
  0x62   : > { %v546_v46 = vsel %vm532_vm4, %v543_v38, %v545_v42  ;;  %v572_v49 = vand.u32 65535, %v542_v45  ;;  %v573_v50 = vshrl.u32 %v542_v45, 16  ;;  %v538_v23 = vsel %vm532_vm4, %v535_v0, %v537_v15  ;;  %v902_v42 = vld [vmem:[%s1437_s30 + $0x18] sm:$0xff] }
  0x63   : > { %v550_v47 = vand.u32 65535, %v546_v46  ;;  %v551_v48 = vshrl.u32 %v546_v46, 16  ;;  %v592_v27 = vmul.u32 %v1458_v34, %v538_v23  ;;  %v458_v34 = vld [vmem:[%s1437_s30] sm:$0xff]  ;;  %v904_v45 = vld [vmem:[%s1445_s7 + $0x8] sm:$0xff]  ;;  %vm695_vm4 = vcmask 1041408  }
  0x64   : > { %v574_v55 = vmul.u32 %v572_v49, %v548_v43  ;;  %v575_v56 = vmul.u32 %v573_v50, %v548_v43  ;;  %v576_v57 = vmul.u32 %v572_v49, %v549_v44  ;;  %v577_v61 = vmul.u32 %v573_v50, %v549_v44  ;;  %v905_v46 = vld [vmem:[%s1445_s7 + $0x10] sm:$0xff] }
  0x65   : > { %v552_v52 = vmul.u32 %v550_v47, %v548_v43  ;;  %v553_v53 = vmul.u32 %v551_v48, %v548_v43  ;;  %v554_v54 = vmul.u32 %v550_v47, %v549_v44  ;;  %v555_v58 = vmul.u32 %v551_v48, %v549_v44  ;;  %v467_v43 = vld [vmem:[%s1445_s7] sm:$0xff]  ;;  %v906_v47 = vld [vmem:[%s1445_s7 + $0x18] sm:$0xff] }
  0x66   : > { %v578_v62 = vshll.u32 %v575_v56, 16  ;;  %v580_v63 = vshll.u32 %v576_v57, 16  ;;  %v579_v12 = vshrl.u32 %v575_v56, 16  ;;  %v581_v19 = vshrl.u32 %v576_v57, 16 }
  0x67   : > { %v556_v59 = vshll.u32 %v553_v53, 16  ;;  %v558_v60 = vshll.u32 %v554_v54, 16  ;;  %v557_v8 = vshrl.u32 %v553_v53, 16  ;;  %v559_v16 = vshrl.u32 %v554_v54, 16 }
  0x68   : > { %vm582_vm6 = vc.u32 %v574_v55, %v578_v62  ;;  %v584_v7 = vadd.s32 %v578_v62, %v574_v55  ;;  %v476_v51 = vadd.f32 %v901_v41, %v458_v34  ;;  %v479_v55 = vadd.f32 %v905_v46, %v467_v43 }
  0x69   : > { %vm560_vm5 = vc.u32 %v552_v52, %v556_v59  ;;  %v562_v1 = vadd.s32 %v556_v59, %v552_v52  ;;  %v583_v10 = vsel %vm582_vm6, 1, %v1271_v4  ;;  %v477_v52 = vadd.f32 %v902_v42, %v900_v39 }
  0x6a   : > { %v561_v5 = vsel %vm560_vm5, 1, %v1271_v4  ;;  %v585_v14 = vadd.s32 %v583_v10, %v577_v61  ;;  %vm586_vm8 = vc.u32 %v584_v7, %v580_v63  ;;  %v588_v22 = vadd.s32 %v584_v7, %v580_v63 }
  0x6b   : > { %v563_v9 = vadd.s32 %v561_v5, %v555_v58  ;;  %vm564_vm7 = vc.u32 %v562_v1, %v558_v60  ;;  %v587_v18 = vsel %vm586_vm8, 1, %v1271_v4  ;;  %v480_v56 = vadd.f32 %v906_v47, %v904_v45 }
  0x6c   : > { %v565_v11 = vsel %vm564_vm7, 1, %v1271_v4  ;;  %v589_v20 = vadd.s32 %v587_v18, %v585_v14  ;;  %v482_v57 = vmin.f32 %v900_v39, %v904_v45  ;;  %v485_v58 = vmin.f32 %v458_v34, %v467_v43  ;;  %v457_v18 = vld [vmem:[%s377_s25] sm:$0xff] }
  0x6d   : > { %v567_v17 = vadd.s32 %v565_v11, %v563_v9  ;;  %v483_v59 = vmin.f32 %v902_v42, %v906_v47  ;;  %v486_v60 = vmin.f32 %v901_v41, %v905_v46  ;;  %v478_v1 = vmul.f32 %v477_v52, %v476_v51 }
  0x6e   : > { %v590_v24 = vadd.s32 %v589_v20, %v579_v12  ;;  %v481_v2 = vmul.f32 %v480_v56, %v479_v55  ;;  %v1272_v47 = vmov 0.0   ;;  %vm697_vm5 = vcmask 1042432  }
  0x6f   : > { %v568_v21 = vadd.s32 %v567_v17, %v557_v8  ;;  %v484_v4 = vadd.f32 %v483_v59, %v482_v57  ;;  %v487_v5 = vadd.f32 %v486_v60, %v485_v58  ;;  %v455_v17 = vld [vmem:[%s357_s23] sm:$0xff]  ;;  %vm699_vm6 = vcmask 1043456  }
  0x70   : > { %v591_v26 = vadd.s32 %v590_v24, %v581_v19  ;;  %v489_v10 = vadd.f32 %v481_v2, %v478_v1  ;;  %v656_v24 = vmul.f32 %v457_v18, %v455_v17  ;;  %vm701_vm7 = vcmask 1044480  }
  0x71   : > { %v569_v25 = vadd.s32 %v568_v21, %v559_v16  ;;  %v488_v9 = vmul.f32 %v487_v5, %v484_v4 }
  0x72   : > { %v595_v28 = vadd.s32 1, %v591_v26  ;;  %v669_v39 = vrot.slane %v656_v24, 4  ;;  %vm660_vm14 = vcmp.ne.f32.partialorder %v656_v24, 0.0 }
  0x73   : > { %vm594_vm9 = vc.u32 %v569_v25, %v588_v22  ;;  %v593_v40 = vadd.s32 %v588_v22, %v569_v25  ;;  %v490_v19 = vsub.f32 %v489_v10, %v488_v9  ;;  %v494_v23 = vadd.f32 1.0, %v488_v9  ;;  %v456_v25 = vld [vmem:[%s367_s5] sm:$0xff] }
  0x74   : > { %v596_v29 = vsel %vm594_vm9, %v595_v28, %v591_v26 }
  0x75   : > { %v597_v30 = vadd.s32 %v596_v29, %v592_v27  ;;  %v491_v26 = vadd.f32 1.0, %v490_v19  ;;  %1016 = vlog2.f32 %v494_v23 }
  0x77   : > { %v598_v31 = vadd.s32 536870912, %v597_v30  ;;  %1018 = vlog2.f32 %v491_v26 }
  0x79   : > { %v599_v32 = vshrl.u32 %v598_v31, 30 }
  0x7b   : > { %v600_v33 = vshll.u32 %v599_v32, 30  ;;  %v623_v15 = vsub.s32 4, %v599_v32  ;;  %v1017_v42 = vpop.eup %1016 }
  0x7d   : > { %v601_v13 = vsub.s32 %v597_v30, %v600_v33  ;;  %v624_v6 = vsel %vm501_vm12, %v623_v15, %v599_v32  ;;  %v657_v33 = vmul.f32 %v656_v24, %v456_v25  ;;  %v658_v32 = vmul.f32 %v457_v18, %v456_v25  ;;  %v1019_v43 = vpop.eup %1018 }
  0x7e   : > { %v626_v29 = vsel %vm1501_vm13, 0, %v624_v6 }
  0x7f   : > { %vm602_vm10 = vcmp.lt.s32.totalorder %v601_v13, 0  ;;  %v603_v35 = vsub.s32 0, %v601_v13  ;;  %v663_v34 = vrot.slane %v657_v33, 4  ;;  %v675_v46 = vrot.slane %v658_v32, 4 }
  0x81   : > { %v604_v36 = vsel %vm602_vm10, %v603_v35, %v601_v13  ;;  %v676_v56 = vadd.f32 %v675_v46, %v658_v32 }
  0x82   : > { %v605_v37 = vclz %v604_v36  ;;  %v643_v36 = vand.u32 3, %v626_v29 }
  0x84   : > { %v909_v38 = vadd.s32 4294967294, %v605_v37  ;;  %vm648_vm15 = vcmp.eq.s32.totalorder %v643_v36, 2  ;;  %vm645_vm0 = vcmp.eq.s32.totalorder %v643_v36, 0  ;;  %vm644_vm1 = vcmp.lt.s32.totalorder %v643_v36, 2 }
  0x86   : > { %vm910_vm11 = vcmp.lt.s32.totalorder %v909_v38, 0 }
  0x87   : > { %v608_v44 = vsel %vm910_vm11, 0, %v909_v38 }
  0x88   : > { %v609_v48 = vsub.s32 32, %v608_v44  ;;  %v610_v49 = vshll.u32 %v601_v13, %v608_v44  ;;  %v613_v50 = vsub.s32 4294967266, %v608_v44 }
  0x8a   : > { %v611_v53 = vshrl.u32 %v593_v40, %v609_v48  ;;  %v614_v54 = vadd.s32 127, %v613_v50  ;;  %v911_v48 = vsel %vm660_vm14, 1.0, %v1272_v47  ;;  %v670_v50 = vadd.f32 %v669_v39, %v656_v24 }
  0x8b   : > { %v687_v57 = vrot.slane %v911_v48, 4 }
  0x8c   : > { %v612_v61 = vor.u32 %v611_v53, %v610_v49  ;;  %v615_v62 = vshll.u32 %v614_v54, 23  ;;  %v664_v49 = vadd.f32 %v663_v34, %v657_v33  ;;  %v493_v53 = vmul.f32 0.6931472, %v1019_v43 }
  0x8d   : > { %v496_v54 = vmul.f32 0.6931472, %v1017_v42  ;;  %v671_v60 = vrot.slane %v670_v50, 2  ;;  %v688_v1 = vadd.f32 %v911_v48, %v687_v57 }
  0x8e   : > { %v616_v63 = vor.u32 4788187, %v615_v62  ;;  %v619_v0 = vcvt.s32.f32 %v612_v61  ;;  %v665_v59 = vrot.slane %v664_v49, 2 }
  0x8f   : > { %v497_v62 = vsub.f32 %v493_v53, %v496_v54  ;;  %v672_v5 = vadd.f32 %v671_v60, %v670_v50  ;;  %v689_v9 = vrot.slane %v688_v1, 2 }
  0x90   : > { %v617_v7 = vand.u32 2147483647, %v616_v63  ;;  %v666_v4 = vadd.f32 %v665_v59, %v664_v49 }
  0x91   : > { %v690_v15 = vadd.f32 %v689_v9, %v688_v1 }
  0x92   : > { %v620_v8 = vmul.f32 %v619_v0, %v617_v7  ;;  %v677_v0 = vrot.slane %v676_v56, 2  ;;  %v667_v11 = vrot.slane %v666_v4, 1 }
  0x94   : > { %v621_v12 = vxor.u32 2147483648, %v620_v8 }
  0x96   : > { %v622_v14 = vsel %vm501_vm12, %v621_v12, %v620_v8  ;;  %v678_v8 = vadd.f32 %v677_v0, %v676_v56 }
  0x97   : > { %v625_v16 = vsel %vm1501_vm13, %v1449_v3, %v622_v14  ;;  %v673_v3 = vrot.slane %v672_v5, 1 }
  0x98   : > { %v627_v20 = vmul.f32 %v625_v16, %v625_v16  ;;  %v679_v14 = vrot.slane %v678_v8, 1 }
  0x99   : > { %v674_v17 = vadd.f32 %v673_v3, %v672_v5 }
  0x9a   : > { %v628_v21 = vmul.f32 -0.001358992, %v627_v20  ;;  %v635_v22 = vmul.f32 -0.00019511016, %v627_v20 }
  0x9c   : > { %v629_v27 = vadd.f32 0.041655596, %v628_v21  ;;  %v636_v28 = vadd.f32 0.008332121, %v635_v22  ;;  %v691_v21 = vrot.slane %v690_v15, 1 }
  0x9e   : > { %v630_v30 = vmul.f32 %v629_v27, %v627_v20  ;;  %v637_v31 = vmul.f32 %v636_v28, %v627_v20  ;;  %v692_v25 = vadd.f32 %v691_v21, %v690_v15  ;;  %v703_v28 = vld [vmem:[#allocation2] sm:$0xff] }
  0xa0   : > { %v631_v13 = vadd.f32 -0.4999988, %v630_v30  ;;  %v638_v35 = vadd.f32 -0.16666654, %v637_v31 }
  0xa2   : > { %v632_v37 = vmul.f32 %v631_v13, %v627_v20  ;;  %v639_v38 = vmul.f32 %v638_v35, %v627_v20  ;;  %v680_v20 = vadd.f32 %v679_v14, %v678_v8 }
  0xa4   : > { %v633_v40 = vadd.f32 1.0, %v632_v37  ;;  %v640_v41 = vadd.f32 1.0, %v639_v38 }
  0xa6   : > { %v641_v44 = vmul.f32 %v640_v41, %v625_v16  ;;  %v649_v45 = vxor.u32 2147483648, %v633_v40  ;;  %v668_v16 = vadd.f32 %v667_v11, %v666_v4 }
  0xa8   : > { %v646_v51 = vxor.u32 2147483648, %v641_v44  ;;  %v650_v52 = vsel %vm648_vm15, %v649_v45, %v641_v44  ;;  %v694_v23 = vsel %vm693_vm3, %v668_v16, %v674_v17 }
  0xa9   : > { %v696_v26 = vsel %vm695_vm4, %v694_v23, %v680_v20 }
  0xaa   : > { %v647_v55 = vsel %vm645_vm0, %v633_v40, %v646_v51 }
  0xab   : > { %v651_v58 = vsel %vm644_vm1, %v647_v55, %v650_v52 }
  0xac   : > { %v652_v61 = vsel %vm642_vm2, nan, %v651_v58 }
  0xad   : > { %v653_v63 = vsub.f32 1.0, %v652_v61 }
  0xaf   : > { %v654_v2 = vmul.f32 20.0, %v653_v63 }
  0xb1   : > { %v655_v7 = vadd.f32 %v654_v2, %v497_v62 }
  0xb3   : > { %v659_v10 = vmul.f32 %v656_v24, %v655_v7 }
  0xb5   : > { %v681_v12 = vrot.slane %v659_v10, 4 }
  0xb7   : > { %v682_v18 = vadd.f32 %v681_v12, %v659_v10 }
  0xb9   : > { %v683_v19 = vrot.slane %v682_v18, 2 }
  0xbb   : > { %v684_v22 = vadd.f32 %v683_v19, %v682_v18 }
  0xbd   : > { %v685_v6 = vrot.slane %v684_v22, 1 }
  0xbf   : > { %v686_v24 = vadd.f32 %v685_v6, %v684_v22 }
  0xc1   : > { %v698_v27 = vsel %vm697_vm5, %v696_v26, %v686_v24 }
  0xc2   : > { %v700_v29 = vsel %vm699_vm6, %v698_v27, %v692_v25  ;;  %707 = sbr.rel (!%p449_p0) target bundleno = 207 (0xcf), region = 68 }
  0xc3   : > { %v702_v30 = vsel %vm701_vm7, %v700_v29, 0.0 }
  0xc4   : > { %v704_v31 = vadd.f32 %v703_v28, %v702_v30 }
  0xc6   : > { %705 = vst [vmem:[#allocation2] sm:$0xff] %v704_v31 }
  0xcd   : > { %v708_v33 = vld [vmem:[#allocation2] sm:$0xff] }
  0xce   : > { %709 = vst [vmem:[#allocation12] sm:$0xff] %v708_v33 }
  0xcf PF: > { %p954_p1 = scmp.eq.s32.totalorder %s1333_s24, 1  ;;  %s1574_s18 = sld [smem:[#allocation26_spill]] }
  0xd0   : > { %s1273_s15 = smov [#allocation12]  }
  0xd1   : > { %s718_s13 = sshll.u32 %s1273_s15, 4  ;;  %s719_s13 = int_to_ptr.vmem [resolvable:$true] %s718_s13 }
  0xd5   : > { %s720_s26 = sshll.u32 %s1574_s18, 4  ;;  %s721_s26 = int_to_ptr.hbm [resolvable:$true] %s720_s26 }
  0xd6   : > { %934 = dma.vmem_to_hbm [thread:$0]  (%p954_p1), %s719_s13, 128, %s721_s26, [#allocation5]  }
  0xd7   : > { %1235 = dma.done.wait (%p954_p1), [#allocation5], 128  }
  0xd8   : > { %1237 = vsyncadd (%p954_p1), [#allocation5], 4294967168 }
  0xd9 PF: > { %s1575_s9 = sld [smem:[#allocation20_spill]]  ;;  %s1580_s18 = smov %s1244_s19 }
  0xda   : > { %s1576_s12 = sld [smem:[#allocation17_spill]] }
  0xdb   : > { %s1577_s20 = sld [smem:[#allocation22_spill]] }
  0xdc   : > { %s1578_s21 = sld [smem:[#allocation19_spill]] }
  0xdd   : > { %s1579_s22 = sld [smem:[#allocation21_spill]] }
  0xdf   : > { %s25_s23 = sadd.s32 1, %s1575_s9  }
  0xe0   : > { %p22_p2 = scmp.ge.s32.totalorder %s25_s23, 4   ;;  %s1581_s19 = smov %s1576_s12 }
  0xe2   :  { %24 = sbr.rel (!%p22_p2) target bundleno = 14 (0xe), region = 142 }
  0xe7   :  { %734 = vsyncpa [#allocation4], 1 }
  0xe8   :  { %736 = vsyncpa [#allocation4 + $0x1], 1 }
  0xe9   :  { %737 = vsyncpa [#allocation7], 1 }
  0xea   :  { %739 = vsyncpa [#allocation7 + $0x1], 1 }
  0xeb   :  { %740 = vsyncpa [#allocation10], 1 }
  0xec   :  { %742 = vsyncpa [#allocation10 + $0x1], 1 }
  0xed   :  { %743 = vsyncpa [#allocation5], 1 }
  0xee   :  { %745 = vsyncpa [#allocation5 + $0x1], 1 }

</bundles_post_ra>
